<compile_context>
chip_gen: v7x
topology: tpu7x:2x2x1
jax: 0.10.0
libtpu: 0.0.40
codegen_flags: <defaults>
</compile_context>

<pallas_src>
import numpy as np
import jax
import jax.numpy as jnp
from jax.experimental import pallas as pl
from jax.experimental.pallas import tpu as pltpu


def _round_up(x, m):
    return ((x + m - 1) // m) * m


def _sublane_multiple(dtype):
    """Native sublane packing: 8 rows for 32-bit, 16 for 16-bit, 32 for 8-bit."""
    itemsize = jnp.dtype(dtype).itemsize
    return max(8, 8 * (4 // max(itemsize, 1)))


def _drop_path_kernel(scale_ref, x_ref, o_ref):
    """scale_ref: (BN, 1) f32 per-sample scale; x_ref/o_ref: (BN, TF) tiles."""
    # Multiply in f32 (scale is f32, so the product promotes), cast once on store.
    o_ref[...] = (x_ref[...] * scale_ref[...]).astype(o_ref.dtype)


def drop_path(x, drop_prob=None, training=False, *, key=None, seed=0, donate_x=False):
    """JAX/Pallas equivalent of the PyTorch drop_path used by DropPath.forward."""
    if drop_prob is None or drop_prob == 0.0 or not training:
        return x

    if not jnp.issubdtype(x.dtype, jnp.floating):
        raise TypeError(f"drop_path requires a floating dtype, got {x.dtype}")

    keep_prob = 1.0 - float(drop_prob)
    N = x.shape[0]
    F = int(np.prod(x.shape[1:])) if x.ndim > 1 else 1
    x2 = x.reshape(N, F)  # contiguous collapse of trailing dims: no HBM copy
    itemsize = jnp.dtype(x.dtype).itemsize

    # Per-sample Bernoulli keep mask, matching torch's floor(keep_prob + U[0,1)).
    if key is None:
        key = jax.random.PRNGKey(seed)
    u = jax.random.uniform(key, (N,), dtype=jnp.float32)
    mask = jnp.floor(jnp.float32(keep_prob) + u)                 # 0.0 or 1.0
    scale = (mask * jnp.float32(1.0 / keep_prob)).reshape(N, 1)  # fold 1/keep_prob

    # Lane-dense tiling over the UNPADDED array; edge blocks are masked by Pallas.
    sub = _sublane_multiple(x.dtype)
    TF = min(_round_up(F, 128), 8192)
    target_block_bytes = 4 << 20  # ~4 MiB block: amortizes per-step overhead on v6e/v7x
    bn_cap = max(sub, (target_block_bytes // (TF * itemsize)) // sub * sub)
    BN = min(_round_up(N, sub), bn_cap)

    gi = pl.cdiv(N, BN)
    gj = pl.cdiv(F, TF)
    # v7x megacore: guarantee >= 2 parallel grid steps when the array allows it.
    while gi * gj < 2 and TF > 256:
        TF //= 2
        gj = pl.cdiv(F, TF)

    cost = pl.CostEstimate(
        flops=N * F,
        transcendentals=0,
        bytes_accessed=2 * N * F * itemsize + N * 4,
    )

    out = pl.pallas_call(
        _drop_path_kernel,
        out_shape=jax.ShapeDtypeStruct((N, F), x.dtype),
        grid=(gi, gj),  # feature axis innermost: scale tile re-fetched once per row-block
        in_specs=[
            pl.BlockSpec((BN, 1), lambda i, j: (i, 0)),    # per-sample scales
            pl.BlockSpec((BN, TF), lambda i, j: (i, j)),   # x tile
        ],
        out_specs=pl.BlockSpec((BN, TF), lambda i, j: (i, j)),
        compiler_params=pltpu.CompilerParams(
            dimension_semantics=("parallel", "parallel"),
            vmem_limit_bytes=48 << 20,  # blocks double-buffered (in+out) << this, < v7x 64 MiB
        ),
        cost_estimate=cost,
        input_output_aliases=({1: 0} if donate_x else {}),
    )(scale, x2)

    return out.reshape(x.shape)


class DropPath:
    """Mirror of the PyTorch DropPath module (no parameters)."""

    def __init__(self, drop_prob=None):
        self.drop_prob = drop_prob
        self.training = True

    def __call__(self, x, seed=0, key=None):
        return drop_path(x, self.drop_prob, self.training, seed=seed, key=key)

    def extra_repr(self):
        return "p={}".format(self.drop_prob)


if __name__ == "__main__":
    key = jax.random.PRNGKey(0)
    # Small NCHW input consistent with a conv-style feature map.
    x = jax.random.normal(key, (2, 4, 16, 16), dtype=jnp.float32)

    keep_prob = 0.8
    module = DropPath(drop_prob=0.2)
    module.training = True

    # --- Training mode: per-sample stochastic depth, exact reference check. ---
    y_train = jax.block_until_ready(module(x, seed=123))
    u = np.asarray(jax.random.uniform(jax.random.PRNGKey(123), (x.shape[0],), dtype=jnp.float32))
    ref_mask = np.floor(keep_prob + u).reshape(-1, 1, 1, 1)
    expected = np.asarray(x) * ref_mask / keep_prob
    assert np.allclose(np.asarray(y_train), expected, rtol=1e-6, atol=1e-6), \
        "train-mode output does not match reference drop_path"

    # --- Non-aligned shape + bf16: exercises edge-block masking & dtype-aware BN. ---
    xb = jax.random.normal(jax.random.PRNGKey(1), (3, 5, 7), dtype=jnp.bfloat16)
    yb = jax.block_until_ready(drop_path(xb, 0.3, True, seed=7))
    kp = 0.7
    for n in range(xb.shape[0]):
        yn = np.asarray(yb[n], dtype=np.float32)
        xn = np.asarray(xb[n], dtype=np.float32)
        is_dropped = np.allclose(yn, 0.0)
        is_kept = np.allclose(yn, xn / kp, rtol=2e-2, atol=2e-2)
        assert is_dropped or is_kept, "bf16 sample is neither fully dropped nor scaled-kept"

    # --- Eval mode (or drop_prob == 0): identity. ---
    module.training = False
    y_eval = jax.block_until_ready(module(x))
    assert np.allclose(np.asarray(y_eval), np.asarray(x))

    print("KERNEL_OK")
</pallas_src>

<mosaic_0001>
module attributes {stable_mosaic.version = 11 : i64} {
  func.func @_drop_path_kernel(%arg0: i32, %arg1: i32, %arg2: memref<8x1xf32, #tpu.memory_space<vmem>>, %arg3: memref<8x512xf32, #tpu.memory_space<vmem>>, %arg4: memref<8x512xf32, #tpu.memory_space<vmem>>) attributes {dimension_semantics = [#tpu.dimension_semantics<parallel>, #tpu.dimension_semantics<parallel>], iteration_bounds = array<i64: 1, 2>, scalar_prefetch = 0 : i64, scratch_operands = 0 : i64, tpu.core_type = #tpu.core_type<tc>, window_params = [{transform_indices = @transform_0, window_bounds = array<i64: 8, 1>}, {transform_indices = @transform_1, window_bounds = array<i64: 8, 512>}, {transform_indices = @transform_2, window_bounds = array<i64: 8, 512>}]} {
    %c0 = arith.constant 0 : index
    %c0_0 = arith.constant 0 : index
    %0 = vector.load %arg3[%c0, %c0_0] : memref<8x512xf32, #tpu.memory_space<vmem>>, vector<8x512xf32>
    %c0_1 = arith.constant 0 : index
    %c0_2 = arith.constant 0 : index
    %1 = vector.load %arg2[%c0_1, %c0_2] : memref<8x1xf32, #tpu.memory_space<vmem>>, vector<8x1xf32>
    %2 = vector.broadcast %1 : vector<8x1xf32> to vector<8x512xf32>
    %3 = arith.mulf %0, %2 : vector<8x512xf32>
    %c0_3 = arith.constant 0 : index
    %c0_4 = arith.constant 0 : index
    %4 = vector.load %arg4[%c0_3, %c0_4] : memref<8x512xf32, #tpu.memory_space<vmem>>, vector<8x512xf32>
    tpu.vector_store %arg4[%c0_3, %c0_4], %3 {strides = array<i32>} : memref<8x512xf32, #tpu.memory_space<vmem>>, vector<8x512xf32>,
    return
  }
  func.func @transform_0(%arg0: i32, %arg1: i32) -> (i32, i32) {
    %c0_i32 = arith.constant 0 : i32
    %c0_i32_0 = arith.constant 0 : i32
    return %arg0, %c0_i32 : i32, i32
  }
  func.func @transform_1(%arg0: i32, %arg1: i32) -> (i32, i32) {
    %c0_i32 = arith.constant 0 : i32
    return %arg0, %arg1 : i32, i32
  }
  func.func @transform_2(%arg0: i32, %arg1: i32) -> (i32, i32) {
    %c0_i32 = arith.constant 0 : i32
    return %arg0, %arg1 : i32, i32
  }
}

</mosaic_0001>

<bundles_post_ra>
// kernel: tpu_custom_call.1
= control target key start
LH: loop header
LB: loop body
LE: loop exit
PB: predicated region body
PF: predicated region fallthrough
CT: control target
= control target key end

     0   :  { %7 = vsyncpa [#allocation3], 0  ;;  %s778_s0 = inlined_call_operand.vmem [shape: f32[2,1], index: 0, kind: input, shape index: {}]   ;;  %s779_s1 = inlined_call_operand.hbm [shape: f32[2,1024], index: 1, kind: input, shape index: {}]   ;;  %s780_s2 = inlined_call_operand.hbm [shape: f32[2,1024], index: 2, kind: output, shape index: {}]  }
   0x1   :  { %9 = vsyncpa [#allocation3 + $0x1], 0 }
   0x2   :  { %10 = vsyncpa [#allocation4], 0 }
   0x3   :  { %12 = vsyncpa [#allocation4 + $0x1], 0  ;;  %s618_s9 = smov 0   ;;  %s620_s10 = smov 0  }
   0x4   :  { %s622_s11 = smov 0   ;;  %s624_s12 = smov 0  }
   0x5   :  { %s626_s13 = smov 0   ;;  %s628_s14 = smov 0  }
   0x6 LB: > { %s401_s15 = sadd.s32 4294967295, %s588_s14   ;;  %s402_s16 = sadd.s32 4294967294, %s588_s14   ;;  %s588_s14 = sphi %s628_s14, %s18_s14   ;;  %s584_s13 = sphi %s626_s13, %s791_s13   ;;  %s580_s12 = sphi %s624_s12, %s790_s12   ;;  %s576_s11 = sphi %s622_s11, %s789_s11   ;;  %s572_s10 = sphi %s620_s10, %s788_s10   ;;  %s568_s9 = sphi %s618_s9, %s787_s9  }
   0x7   : > { %s27_s17 = sadd.s32 1, %s584_s13  ;;  %s65_s18 = sadd.s32 1, %s576_s11 }
   0x8   : > { %p28_p0 = scmp.ge.s32.totalorder %s27_s17, 2  ;;  %p72_p1 = scmp.ne.s32.totalorder %s576_s11, %s572_s10 }
   0x9   : > { %p73_p2 = scmp.eq.s32.totalorder %s588_s14, 0  ;;  %p78_p3 = scmp.ne.s32.totalorder %s572_s10, %s568_s9 }
   0xa   : > { %s793_s17 = smov (%p28_p0, %s27_s17), 0  ;;  %p79_p5 = scmp.eq.s32.totalorder %s401_s15, 0 }
   0xb   : > { %p74_p4 = por %p73_p2, %p72_p1  ;;  %s61_s19 = ssub.s32 %s584_s13, %s793_s17 }
   0xc   : > { %p104_p6 = scmp.eq.s32.totalorder %s401_s15, 1  ;;  %p63_p7 = scmp.eq.s32.totalorder %s61_s19, 0 }
   0xd   : > { %p661_p8 = por %p79_p5, %p78_p3  ;;  %p110_p10 = scmp.eq.s32.totalorder %s402_s16, 1 }
   0xe   : > { %p665_p9 = por %p104_p6, %p72_p1  ;;  %p781_p12 = scmp.ge.s32.totalorder %s588_s14, 2 }
   0xf   : > { %s670_s22 = scalar_select %p63_p7, %s576_s11, %s65_s18  }
  0x10   : > { %p672_p11 = por %p110_p10, %p78_p3  ;;  %139 = sbr.rel (%p781_p12) target bundleno = 55 (0x37), region = 20 }
  0x12   : > { %s784_s23 = scalar_select %p672_p11, 1, 0 }
  0x17   : > { %142 = sbr.rel (!%p74_p4) target bundleno = 55 (0x37), region = 24  ;;  %s143_s24 = sand.u32 (%p74_p4), 1, %s576_s11  }
  0x18   : > { %s406_s25 = sshll.u32 (%p74_p4), %s143_s24, 5  ;;  %s680_s26 = scalar_lea.sflag (%p74_p4), [#allocation3], %s143_s24 }
  0x19   : > { %s147_s27 = scalar_lea.vmem (%p74_p4), [#allocation2], %s406_s25 }
  0x1e   : > { %155 = vsyncadd %s680_s26, 384  ;;  %s417_s28 = sshll.u32 %s584_s13, 7  ;;  %s162_s29 = sshll.u32 %s147_s27, 4  ;;  %s689_s29 = int_to_ptr.vmem [resolvable:$true] %s162_s29 }
  0x1f   : > { %s687_s4 = scalar_lea.hbm %s779_s1, %s417_s28  ;;  %s488_s8 = scalar_lea.hbm %s779_s1, 256 }
  0x20   : > { %s486_s5 = scalar_lea.hbm %s687_s4, 128  ;;  %p489_p0 = scmp.lt.u32.totalorder %s687_s4, %s779_s1 }
  0x21   : > { %p487_p13 = scmp.ne.s32.totalorder %s687_s4, %s486_s5  ;;  %p490_p1 = scmp.lt.u32.totalorder %s488_s8, %s486_s5 }
  0x22   : > { %p492_p3 = scmp.lt.u32.totalorder %s486_s5, %s687_s4 }
  0x23   : > { %p491_p2 = por %p490_p1, %p489_p0 }
  0x25   : > { %p493_p4 = por %p492_p3, %p491_p2 }
  0x27   : > { %p494_p5 = pnand %p493_p4, %p487_p13 }
  0x29   : > { %497 = shalt.err (!%p494_p5)
}
  0x2a   : > { %s498_s18 = scalar_lea.vmem %s689_s29, 128  ;;  %s590_s19 = smov [#allocation2]  }
  0x2b   : > { %p499_p6 = scmp.ne.s32.totalorder %s689_s29, %s498_s18  ;;  %s500_s24 = sshll.u32 %s590_s19, 4  ;;  %s501_s24 = int_to_ptr.vmem [resolvable:$false] %s500_s24 }
  0x2c   : > { %s502_s25 = scalar_lea.vmem %s501_s24, 1024  ;;  %p503_p7 = scmp.lt.s32.totalorder %s689_s29, %s501_s24 }
  0x2d   : > { %p504_p10 = scmp.lt.s32.totalorder %s502_s25, %s498_s18 }
  0x2f   : > { %p505_p12 = por %p504_p10, %p503_p7 }
  0x31   : > { %p506_p11 = pnand %p505_p12, %p499_p6 }
  0x33   : > { %509 = shalt.err (!%p506_p11)
}
  0x34   : > { %s591_s27 = smov 256   ;;  %s592_s28 = smov 128  }
  0x35   : > { %s593_s30 = smov 8  }
  0x36   : > { %168 = dma.hbm_to_vmem [thread:$0]  %s687_s4, 128, %s689_s29, %s680_s26, %s591_s27, %s592_s28, %s593_s30  }
  0x37 PF: > { %p409_p13 = scmp.ge.s32.totalorder %s588_s14, 1  ;;  %p170_p0 = scmp.lt.s32.totalorder %s588_s14, 3 }
  0x39   : > { %p171_p1 = pnand %p409_p13, %p170_p0 }
  0x3a   : > { %s710_s3 = sand.u32 (!%p171_p1), 1, %s572_s10  }
  0x3b   : > { %174 = sbr.rel (%p171_p1) target bundleno = 229 (0xe5), region = 28  ;;  %s410_s5 = sshll.u32 (!%p171_p1), %s710_s3, 5 }
  0x3c   : > { %s177_s6 = scalar_lea.sflag (!%p171_p1), [#allocation3], %s710_s3  ;;  %s180_s7 = scalar_lea.vmem (!%p171_p1), [#allocation2], %s410_s5 }
  0x42   : > { %559 = dma.done.wait (%p661_p8), %s177_s6, 512  }
  0x43   : > { %561 = vsyncadd (%p661_p8), %s177_s6, 4294966784  ;;  %v594_v0 = vmov 0   ;;  %v232_v1 = vld [vmem:[%s778_s0] sm:$0xff]  ;;  %v240_v2 = vlaneseq  ;;  %v595_v3 = vmov 269488144   ;;  %v229_v22 = vld [vmem:[%s180_s7 + $0x8] sm:$0xff] }
  0x44   : > { %485 = vset.pattern.permute.xlu0 %v594_v0  ;;  %v238_v4 = vunpack.c.l.s4 %v595_v3  ;;  %v596_v5 = vmov 842150450   ;;  %v597_v7 = vmov 1414812756   ;;  %v598_v9 = vmov 1987475062  }
  0x45   : > { %235 = vperm.xlu0 %485, %v232_v1   ;;  %v245_v6 = vunpack.c.l.s4 %v596_v5  ;;  %v252_v8 = vunpack.c.l.s4 %v597_v7  ;;  %v259_v10 = vunpack.c.l.s4 %v598_v9  ;;  %v241_v11 = vshrl.u32 %v240_v2, 7  ;;  %v228_v20 = vld [vmem:[%s180_s7] sm:$0xff]  ;;  %v230_v23 = vld [vmem:[%s180_s7 + $0x10] sm:$0xff]  ;;  %v231_v24 = vld [vmem:[%s180_s7 + $0x18] sm:$0xff]  ;;  %s207_s20 = scalar_lea.vmem [#allocation5], %s410_s5  ;;  %s278_s4 = scalar_lea.sflag [#allocation4], %s710_s3 }
  0x46   : > { %v239_v12 = vunpack.c.0.s8 %v238_v4 }
  0x47   : > { %v246_v13 = vunpack.c.0.s8 %v245_v6  ;;  %v253_v14 = vunpack.c.0.s8 %v252_v8  ;;  %v260_v15 = vunpack.c.0.s8 %v259_v10 }
  0x48   : > { %v242_v16 = vsub.s32 %v239_v12, %v241_v11 }
  0x49   : > { %v249_v17 = vsub.s32 %v246_v13, %v241_v11  ;;  %v256_v18 = vsub.s32 %v253_v14, %v241_v11  ;;  %v263_v19 = vsub.s32 %v260_v15, %v241_v11 }
  0xc4   : > { %v236_v21 = vpop.permute.xlu0 %235  ;;  %284 = sbr.rel (!%p665_p9) target bundleno = 229 (0xe5), region = 36 }
  0xc5   : > { %v243_v25 = vrot.slane %v236_v21, %v242_v16  ;;  %v250_v26 = vrot.slane %v236_v21, %v249_v17  ;;  %v257_v27 = vrot.slane %v236_v21, %v256_v18  ;;  %v264_v28 = vrot.slane %v236_v21, %v263_v19 }
  0xc7   : > { %v269_v29 = vmul.f32 %v243_v25, %v228_v20  ;;  %v270_v30 = vmul.f32 %v250_v26, %v229_v22  ;;  %v271_v31 = vmul.f32 %v257_v27, %v230_v23  ;;  %v272_v32 = vmul.f32 %v264_v28, %v231_v24 }
  0xc9   : > { %273 = vst [vmem:[%s207_s20] sm:$0xff] %v269_v29  ;;  %274 = vst [vmem:[%s207_s20 + $0x8] sm:$0xff] %v270_v30 }
  0xca   : > { %275 = vst [vmem:[%s207_s20 + $0x10] sm:$0xff] %v271_v31  ;;  %276 = vst [vmem:[%s207_s20 + $0x18] sm:$0xff] %v272_v32 }
  0xcb   : > { %292 = vsyncadd %s278_s4, 384  ;;  %s418_s8 = sshll.u32 %s580_s12, 7  ;;  %s299_s15 = sshll.u32 %s207_s20, 4  ;;  %s736_s15 = int_to_ptr.vmem [resolvable:$true] %s299_s15 }
  0xcc   : > { %s734_s19 = scalar_lea.hbm %s780_s2, %s418_s8  ;;  %s510_s24 = scalar_lea.vmem %s736_s15, 128 }
  0xcd   : > { %p511_p8 = scmp.ne.s32.totalorder %s736_s15, %s510_s24  ;;  %s599_s21 = smov [#allocation5]  }
  0xce   : > { %s512_s25 = sshll.u32 %s599_s21, 4  ;;  %s513_s25 = int_to_ptr.vmem [resolvable:$false] %s512_s25 }
  0xcf   : > { %s514_s27 = scalar_lea.vmem %s513_s25, 1024  ;;  %p515_p9 = scmp.lt.s32.totalorder %s736_s15, %s513_s25 }
  0xd0   : > { %p516_p11 = scmp.lt.s32.totalorder %s514_s27, %s510_s24 }
  0xd2   : > { %p517_p12 = por %p516_p11, %p515_p9 }
  0xd4   : > { %p518_p2 = pnand %p517_p12, %p511_p8 }
  0xd6   : > { %521 = shalt.err (!%p518_p2)
}
  0xd7   : > { %s522_s12 = scalar_lea.hbm %s734_s19, 128  ;;  %s524_s5 = scalar_lea.hbm %s780_s2, 256 }
  0xd8   : > { %p523_p3 = scmp.ne.s32.totalorder %s734_s19, %s522_s12  ;;  %p525_p4 = scmp.lt.u32.totalorder %s734_s19, %s780_s2 }
  0xd9   : > { %p526_p5 = scmp.lt.u32.totalorder %s524_s5, %s522_s12  ;;  %p528_p7 = scmp.lt.u32.totalorder %s522_s12, %s734_s19 }
  0xdb   : > { %p527_p6 = por %p526_p5, %p525_p4 }
  0xdd   : > { %p529_p10 = por %p528_p7, %p527_p6 }
  0xdf   : > { %p530_p13 = pnand %p529_p10, %p523_p3 }
  0xe1   : > { %533 = shalt.err (!%p530_p13)
}
  0xe2   : > { %s600_s26 = smov 128   ;;  %s601_s29 = smov 256  }
  0xe3   : > { %s602_s20 = smov 8  }
  0xe4   : > { %305 = dma.vmem_to_hbm [thread:$0]  %s736_s15, 128, %s734_s19, %s278_s4, %s600_s26, %s601_s29, %s602_s20  }
  0xe5 PF: > { %s314_s8 = sand.u32 1, %s568_s9   ;;  %p785_p0 = scmp.ne.s32.totalorder %s784_s23, 0 }
  0xe6   : > { %p786_p1 = scmp.ge.s32.totalorder %s588_s14, 2  ;;  %s315_s16 = scalar_lea.sflag [#allocation4], %s314_s8 }
  0xe8   : > { %p422_p8 = pnand %p786_p1, %p785_p0 }
  0xea   : > { %563 = dma.done.wait (!%p422_p8), %s315_s16, 512  }
  0xeb   : > { %565 = vsyncadd (!%p422_p8), %s315_s16, 4294966784  ;;  %s18_s14 = sadd.s32 1, %s588_s14   ;;  %s787_s9 = smov %s572_s10 }
  0xec   : > { %p15_p9 = scmp.ge.s32.totalorder %s18_s14, 4   ;;  %s788_s10 = smov %s576_s11 }
  0xed   : > { %s789_s11 = smov %s670_s22  ;;  %s790_s12 = smov %s584_s13 }
  0xee   : > { %s791_s13 = smov %s793_s17  ;;  %17 = sbr.rel (!%p15_p9) target bundleno = 6 (0x6), region = 76 }
  0xf5   :  { %320 = vsyncpa [#allocation3], 1 }
  0xf6   :  { %322 = vsyncpa [#allocation3 + $0x1], 1 }
  0xf7   :  { %323 = vsyncpa [#allocation4], 1 }
  0xf8   :  { %325 = vsyncpa [#allocation4 + $0x1], 1 }

</bundles_post_ra>
